<compile_context>
chip_gen: v7x
topology: tpu7x:2x2x1
jax: 0.10.0
libtpu: 0.0.40
codegen_flags: <defaults>
</compile_context>

<pallas_src>
import jax
import jax.numpy as jnp
from jax.experimental import pallas as pl
from jax.experimental.pallas import tpu as pltpu

IN_FEATURES = 3
OUT_FEATURES = 4
OUT_PAD = 128  # lane-dense padded output width


def _linear_vpu_kernel(x_ref, w_ref, b_ref, o_ref):
    # x_ref : [B, IN]        IN = 3 (legal: equals full array extent)
    # w_ref : [IN, OUT_PAD]  weight.T zero-padded to 128 lanes (prepped once)
    # b_ref : [1, OUT_PAD]   bias zero-padded to 128 lanes
    # o_ref : [B, OUT_PAD]   lane-dense output block
    x = x_ref[...]
    w = w_ref[...]
    # Hoisted broadcast of the bias to the full output tile.
    y = jnp.broadcast_to(b_ref[...], o_ref.shape)
    # K=3 contraction unrolled on the VPU: 3 broadcast multiplies + 3 adds.
    # Stays entirely in the VALU slots; no MXU push/pop for a 3-deep reduction.
    for k in range(x_ref.shape[1]):
        y = y + x[:, k:k + 1] * w[k:k + 1, :]
    o_ref[...] = y.astype(o_ref.dtype)


def prepare_linear_params(weight, bias):
    """One-time layout prep (outside the per-call path).

    weight: [OUT, IN] (PyTorch nn.Linear convention)
    bias:   [OUT]
    returns (w_pad [IN, OUT_PAD], b_pad [1, OUT_PAD]) zero-padded, lane-dense.
    """
    out_f, in_f = weight.shape
    w_pad = jnp.zeros((in_f, OUT_PAD), jnp.float32).at[:, :out_f].set(weight.T)
    b_pad = jnp.zeros((1, OUT_PAD), jnp.float32).at[:, :out_f].set(bias)
    return w_pad, b_pad


def linear_pallas(x, w_pad, b_pad):
    """y = x @ W^T + b via a single-block Pallas kernel on padded lanes.

    x:     [B, IN]        float32
    w_pad: [IN, OUT_PAD]  float32 (from prepare_linear_params)
    b_pad: [1, OUT_PAD]   float32
    returns [B, OUT_FEATURES] float32
    """
    B = x.shape[0]
    y_pad = pl.pallas_call(
        _linear_vpu_kernel,
        out_shape=jax.ShapeDtypeStruct((B, OUT_PAD), jnp.float32),
        in_specs=[
            pl.BlockSpec(memory_space=pltpu.MemorySpace.VMEM),
            pl.BlockSpec(memory_space=pltpu.MemorySpace.VMEM),
            pl.BlockSpec(memory_space=pltpu.MemorySpace.VMEM),
        ],
        out_specs=pl.BlockSpec(memory_space=pltpu.MemorySpace.VMEM),
    )(x, w_pad, b_pad)
    # Slice the real 4 output features back out (outside the kernel).
    return y_pad[:, :OUT_FEATURES]


def init_net_params(key):
    """Deterministically initialize Net's parameters (shapes from __init__)."""
    k_w, k_b = jax.random.split(key)
    bound = 1.0 / jnp.sqrt(jnp.float32(IN_FEATURES))
    weight = jax.random.uniform(
        k_w, (OUT_FEATURES, IN_FEATURES), jnp.float32, -bound, bound)
    l_bias = jax.random.uniform(
        k_b, (OUT_FEATURES,), jnp.float32, -bound, bound)
    extra_bias = jnp.zeros((5,), jnp.float32)  # registered but unused
    return {"l.weight": weight, "l.bias": l_bias, "bias": extra_bias}


if __name__ == "__main__":
    key = jax.random.PRNGKey(0)
    params = init_net_params(key)

    # One-time lane-dense layout prep (not in the per-call path).
    w_pad, b_pad = prepare_linear_params(params["l.weight"], params["l.bias"])

    # Small example input consistent with Linear(3, 4): batch=8, features=3.
    B = 8
    x = jax.random.normal(jax.random.PRNGKey(1), (B, IN_FEATURES), jnp.float32)

    y = linear_pallas(x, w_pad, b_pad)
    y = jax.block_until_ready(y)

    # Sanity check against the plain-JAX reference.
    y_ref = x @ params["l.weight"].T + params["l.bias"]
    assert y.shape == (B, OUT_FEATURES)
    assert jnp.allclose(y, y_ref, atol=1e-5, rtol=1e-5)

    print("KERNEL_OK")
</pallas_src>

<mosaic_0001>
module attributes {stable_mosaic.version = 11 : i64} {
  func.func @_linear_vpu_kernel(%arg0: memref<8x3xf32, #tpu.memory_space<vmem>>, %arg1: memref<3x128xf32, #tpu.memory_space<vmem>>, %arg2: memref<1x128xf32, #tpu.memory_space<vmem>>, %arg3: memref<8x128xf32, #tpu.memory_space<vmem>>) attributes {dimension_semantics = [], scalar_prefetch = 0 : i64, scratch_operands = 0 : i64, tpu.core_type = #tpu.core_type<tc>} {
    %c0 = arith.constant 0 : index
    %c0_0 = arith.constant 0 : index
    %0 = vector.load %arg0[%c0, %c0_0] : memref<8x3xf32, #tpu.memory_space<vmem>>, vector<8x3xf32>
    %c0_1 = arith.constant 0 : index
    %c0_2 = arith.constant 0 : index
    %1 = vector.load %arg1[%c0_1, %c0_2] : memref<3x128xf32, #tpu.memory_space<vmem>>, vector<3x128xf32>
    %c0_3 = arith.constant 0 : index
    %c0_4 = arith.constant 0 : index
    %2 = vector.load %arg2[%c0_3, %c0_4] : memref<1x128xf32, #tpu.memory_space<vmem>>, vector<1x128xf32>
    %3 = vector.shape_cast %2 : vector<1x128xf32> to vector<1x128xf32>
    %4 = vector.broadcast %3 : vector<1x128xf32> to vector<8x128xf32>
    %5 = vector.extract_strided_slice %0 {offsets = [0, 0], sizes = [8, 1], strides = [1, 1]} : vector<8x3xf32> to vector<8x1xf32>
    %6 = vector.extract_strided_slice %1 {offsets = [0, 0], sizes = [1, 128], strides = [1, 1]} : vector<3x128xf32> to vector<1x128xf32>
    %7 = vector.broadcast %5 : vector<8x1xf32> to vector<8x128xf32>
    %8 = vector.broadcast %6 : vector<1x128xf32> to vector<8x128xf32>
    %9 = arith.mulf %7, %8 : vector<8x128xf32>
    %10 = arith.addf %4, %9 : vector<8x128xf32>
    %11 = vector.extract_strided_slice %0 {offsets = [0, 1], sizes = [8, 1], strides = [1, 1]} : vector<8x3xf32> to vector<8x1xf32>
    %12 = vector.extract_strided_slice %1 {offsets = [1, 0], sizes = [1, 128], strides = [1, 1]} : vector<3x128xf32> to vector<1x128xf32>
    %13 = vector.broadcast %11 : vector<8x1xf32> to vector<8x128xf32>
    %14 = vector.broadcast %12 : vector<1x128xf32> to vector<8x128xf32>
    %15 = arith.mulf %13, %14 : vector<8x128xf32>
    %16 = arith.addf %10, %15 : vector<8x128xf32>
    %17 = vector.extract_strided_slice %0 {offsets = [0, 2], sizes = [8, 1], strides = [1, 1]} : vector<8x3xf32> to vector<8x1xf32>
    %18 = vector.extract_strided_slice %1 {offsets = [2, 0], sizes = [1, 128], strides = [1, 1]} : vector<3x128xf32> to vector<1x128xf32>
    %19 = vector.broadcast %17 : vector<8x1xf32> to vector<8x128xf32>
    %20 = vector.broadcast %18 : vector<1x128xf32> to vector<8x128xf32>
    %21 = arith.mulf %19, %20 : vector<8x128xf32>
    %22 = arith.addf %16, %21 : vector<8x128xf32>
    %c0_5 = arith.constant 0 : index
    %c0_6 = arith.constant 0 : index
    %23 = vector.load %arg3[%c0_5, %c0_6] : memref<8x128xf32, #tpu.memory_space<vmem>>, vector<8x128xf32>
    tpu.vector_store %arg3[%c0_5, %c0_6], %22 {strides = array<i32>} : memref<8x128xf32, #tpu.memory_space<vmem>>, vector<8x128xf32>,
    return
  }
}

</mosaic_0001>

<bundles_post_ra>
// kernel: tpu_custom_call.1
= control target key start
LH: loop header
LB: loop body
LE: loop exit
PB: predicated region body
PF: predicated region fallthrough
CT: control target
= control target key end

     0   :  { %v103_v1 = vmov 0   ;;  %v104_v2 = vmov 2   ;;  %s148_s0 = inlined_call_operand.vmem [shape: f32[8,3], index: 0, kind: input, shape index: {}]   ;;  %s149_s1 = inlined_call_operand.vmem [shape: f32[3,128], index: 1, kind: input, shape index: {}]   ;;  %s150_s2 = inlined_call_operand.vmem [shape: f32[1,128], index: 2, kind: input, shape index: {}]   ;;  %s151_s3 = inlined_call_operand.hbm [shape: f32[8,128], index: 3, kind: output, shape index: {}]  }
   0x1   :  { %v15_v0 = vld [vmem:[%s148_s0] sm:$0xff]  ;;  %75 = vset.pattern.permute.xlu0 %v103_v1  ;;  %77 = vset.pattern.permute.xlu1 %v104_v2 }
   0x2   :  { %8 = vsyncpa [#allocation3], 0  ;;  %26 = vperm.xlu0 %75, %v15_v0   ;;  %46 = vperm.xlu1 %77, %v15_v0   ;;  %v105_v3 = vmov 1   ;;  %v29_v4 = vlaneseq  ;;  %v16_v7 = vld [vmem:[%s149_s1] sm:$0x7]  ;;  %s106_s17 = smov [#allocation2]  }
   0x3   :  { %v70_v15 = vld [vmem:[%s150_s2] ss:$0 sm:$0xff]  ;;  %s62_s18 = sshll.u32 %s106_s17, 4  ;;  %s63_s18 = int_to_ptr.vmem [resolvable:$true] %s62_s18 }
   0x4   :  { %v30_v5 = vshrl.u32 %v29_v4, 7  ;;  %s79_s1 = scalar_lea.vmem %s63_s18, 128  ;;  %p84_p1 = scmp.lt.s32.totalorder %s63_s18, %s63_s18 }
   0x5   :  { %p80_p0 = scmp.ne.s32.totalorder %s63_s18, %s79_s1  ;;  %p85_p2 = scmp.lt.s32.totalorder %s79_s1, %s79_s1 }
   0x6   :  { %76 = vset.pattern.permute.xlu0 %v105_v3  ;;  %v31_v6 = vsub.s32 0, %v30_v5  ;;  %v41_v9 = vsub.s32 1, %v30_v5  ;;  %v51_v10 = vsub.s32 2, %v30_v5 }
   0x7   :  { %36 = vperm.xlu0 %76, %v15_v0   ;;  %p86_p3 = por %p85_p2, %p84_p1 }
   0x8   :  { %v32_v8 = vrot.slane %v16_v7, %v31_v6  ;;  %v42_v13 = vrot.slane %v16_v7, %v41_v9  ;;  %v52_v14 = vrot.slane %v16_v7, %v51_v10 }
   0x9   :  { %p87_p4 = pnand %p86_p3, %p80_p0 }
   0xb   :  { %78 = vset.pattern.permute.xlu0 %v104_v2 }
  0x81   :  { %v27_v11 = vpop.permute.xlu0 %26  ;;  %v47_v16 = vpop.permute.xlu1 %46 }
  0x82   :  { %v33_v12 = vmul.f32 %v32_v8, %v27_v11  ;;  %v53_v20 = vmul.f32 %v52_v14, %v47_v16 }
  0x84   :  { %v34_v18 = vadd.f32 %v70_v15, %v33_v12 }
  0x86   :  { %v37_v17 = vpop.permute.xlu0 %36 }
  0x87   :  { %v43_v19 = vmul.f32 %v42_v13, %v37_v17 }
  0x89   :  { %v44_v21 = vadd.f32 %v43_v19, %v34_v18 }
  0x8b   :  { %v54_v22 = vadd.f32 %v53_v20, %v44_v21 }
  0x8d   :  { %55 = vst [vmem:[#allocation2] sm:$0xff] %v54_v22 }
  0x8e   :  { %90 = shalt.err (!%p87_p4)
}
  0x8f   :  { %s91_s20 = scalar_lea.hbm %s151_s3, 128 }
  0x90   :  { %p92_p5 = scmp.ne.s32.totalorder %s151_s3, %s91_s20  ;;  %p95_p6 = scmp.lt.u32.totalorder %s91_s20, %s151_s3 }
  0x92   :  { %p97_p7 = pnand %p95_p6, %p92_p5 }
  0x94   :  { %100 = shalt.err (!%p97_p7)
}
  0x95   :  { %65 = dma.vmem_to_hbm [thread:$0]  %s63_s18, 128, %s151_s3, [#allocation3]  }
  0x96   :  { %101 = dma.done.wait [#allocation3], 128  }
  0x97   :  { %102 = vsyncadd [#allocation3], 4294967168 }
  0x98   :  { %69 = vsyncpa [#allocation3], 1 }

</bundles_post_ra>
